<compile_context>
chip_gen: v5e
topology: v5e:2x2
jax: 0.10.0
libtpu: 0.0.40
codegen_flags: <defaults>
</compile_context>

<pallas_src>
import functools

import jax
import jax.numpy as jnp
from jax.experimental import pallas as pl
from jax.experimental.pallas import tpu as pltpu


def _round_up(x, m):
    return ((x + m - 1) // m) * m


def _conv_bn_act_kernel(x_ref, w_ref, shift_ref, o_ref, cols_ref,
                        *, K, D, WP, C1, N, L, act):
    # x_ref:     (C1, N*L)       batch-folded flat padded input (native dtype)
    # w_ref:     (C2, K*K*C1)    BN-scaled weights, row order (kh, kw, c)
    # shift_ref: (C2, 1)         (conv_b - mean) * gamma/sqrt(var+eps) + beta
    # o_ref:     (N, C2, L)      flat stride-1 output per image (L % 128 == 0)
    # cols_ref:  (K*K*C1, N*L)   VMEM im2col scratch (native dtype)
    total = N * L
    x = x_ref[...]                                   # one aligned load, reused

    # Build the im2col slab: each tap is the whole flat slab rotated in the
    # XLU.  pltpu.roll follows jnp.roll semantics, so rolling by (total - off)
    # places input position (i + off) in output lane i; wrapped / cross-image
    # lanes only appear at per-image offsets >= OH1*WP, which are dropped in
    # the wrapper along with the wrap columns.
    for kh in range(K):
        for kw in range(K):
            t = kh * K + kw
            off = kh * D * WP + kw * D
            tap = pltpu.roll(x, (total - off) % total, 1) if off else x
            cols_ref[t * C1:(t + 1) * C1, :] = tap

    # Single MXU matmul with lane-dense (C2, N*L) result; f32 accumulation.
    acc = jnp.dot(w_ref[...], cols_ref[...],
                  preferred_element_type=jnp.float32)

    # BN scale already folded into the weights -> epilogue is add + LeakyReLU.
    y = acc + shift_ref[...]
    if act:
        y = jnp.where(y > 0, y, 0.1 * y)             # LeakyReLU(0.1)
    y = y.astype(o_ref.dtype)

    # Lane-aligned (L % 128 == 0) per-image stores; keeps the output in
    # (N, C2, flat) order so the wrapper needs no transpose.
    for n in range(N):
        o_ref[n, :, :] = y[:, n * L:(n + 1) * L]


def conv_bn_act(x_nchw, w_oihw, conv_bias, gamma, beta, running_mean,
                running_var, *, stride=1, padding=0, dilation=1, groups=1,
                act=True, eps=1e-5):
    assert groups == 1, "grouped conv not implemented"
    N, C1, H, W = x_nchw.shape
    C2, _, K, _ = w_oihw.shape
    S, P, D = stride, padding, dilation

    HP, WP = H + 2 * P, W + 2 * P
    OH1 = HP - (K - 1) * D            # stride-1 output height
    OW1 = WP - (K - 1) * D            # stride-1 output width
    assert OH1 >= 1 and OW1 >= 1, "kernel does not cover the padded input"
    OH = (OH1 - 1) // S + 1
    OW = (OW1 - 1) // S + 1
    n_flat = OH1 * WP                 # used flat stride-1 length (w/ wrap cols)
    max_off = (K - 1) * D * WP + (K - 1) * D
    # Per-image slab length: holds the whole padded image, keeps every tap for
    # used lanes inside the image, and is 128-aligned for lane-dense stores.
    L = _round_up(max(HP * WP, n_flat + max_off), 128)
    TOTAL = N * L

    # Glue (layout plumbing only): spatial pre-pad, flatten H*W, tail-pad each
    # image to L, fold the batch into the lane axis -> (C1, N*L).
    x = jnp.pad(x_nchw, ((0, 0), (0, 0), (P, P), (P, P)))
    x = x.reshape(N, C1, HP * WP)
    x = jnp.pad(x, ((0, 0), (0, 0), (0, L - HP * WP)))
    x_cat = jnp.transpose(x, (1, 0, 2)).reshape(C1, TOTAL)

    # Weights -> (C2, K*K*C1) with (kh, kw, c) row order, BN scale folded in.
    inv_std = 1.0 / jnp.sqrt(running_var.astype(jnp.float32) + eps)
    scale = gamma.astype(jnp.float32) * inv_std                     # (C2,)
    w2 = jnp.transpose(w_oihw, (0, 2, 3, 1)).reshape(C2, K * K * C1)
    w2s = (w2.astype(jnp.float32) * scale[:, None]).astype(x_nchw.dtype)
    shift = ((conv_bias.astype(jnp.float32)
              - running_mean.astype(jnp.float32)) * scale
             + beta.astype(jnp.float32)).reshape(C2, 1)

    kernel = functools.partial(_conv_bn_act_kernel, K=K, D=D, WP=WP, C1=C1,
                               N=N, L=L, act=act)

    itemsize = jnp.dtype(x_nchw.dtype).itemsize
    cost = pl.CostEstimate(
        flops=2 * C2 * (K * K * C1) * TOTAL,
        transcendentals=0,
        bytes_accessed=(C1 * TOTAL + C2 * K * K * C1 + N * C2 * L) * itemsize
        + C2 * 4)

    out_flat = pl.pallas_call(
        kernel,
        out_shape=jax.ShapeDtypeStruct((N, C2, L), x_nchw.dtype),
        grid_spec=pltpu.PrefetchScalarGridSpec(
            num_scalar_prefetch=0,
            grid=(1,),
            in_specs=[
                pl.BlockSpec((C1, TOTAL), lambda i: (0, 0)),
                pl.BlockSpec((C2, K * K * C1), lambda i: (0, 0)),
                pl.BlockSpec((C2, 1), lambda i: (0, 0)),
            ],
            out_specs=pl.BlockSpec((N, C2, L), lambda i: (0, 0, 0)),
            scratch_shapes=[pltpu.VMEM((K * K * C1, TOTAL), x_cat.dtype)],
        ),
        compiler_params=pltpu.CompilerParams(
            dimension_semantics=("arbitrary",)),
        cost_estimate=cost,
    )(x_cat, w2s, shift)

    # Drop padding + wrap-around columns, then apply the output stride.
    # Result is NCHW directly -- no transpose needed.
    y = out_flat[:, :, :n_flat].reshape(N, C2, OH1, WP)[:, :, :, :OW1]
    out = y[:, :, ::S, ::S]
    assert out.shape == (N, C2, OH, OW), out.shape
    return out


def _reference(x, w, b, gamma, beta, mean, var, stride, padding, dilation,
               act, eps=1e-5):
    y = jax.lax.conv_general_dilated(
        x.astype(jnp.float32), w.astype(jnp.float32),
        window_strides=(stride, stride),
        padding=((padding, padding), (padding, padding)),
        rhs_dilation=(dilation, dilation),
        dimension_numbers=("NCHW", "OIHW", "NCHW"))
    y = y + b[None, :, None, None]
    y = (y - mean[None, :, None, None]) / jnp.sqrt(
        var[None, :, None, None] + eps)
    y = y * gamma[None, :, None, None] + beta[None, :, None, None]
    if act:
        y = jnp.where(y > 0, y, 0.1 * y)
    return y


if __name__ == "__main__":
    key = jax.random.PRNGKey(0)
    k_x, k_w, k_b, k_g, k_be, k_m, k_v = jax.random.split(key, 7)

    # Conv(c1=4, c2=8, k=3, s=1, p=1, d=1, g=1, act=True)
    N, C1, C2, H, W, K = 2, 4, 8, 16, 16, 3
    S, P, D, G = 1, 1, 1, 1

    x = jax.random.normal(k_x, (N, C1, H, W), jnp.float32)
    w = 0.1 * jax.random.normal(k_w, (C2, C1 // G, K, K), jnp.float32)
    b = 0.1 * jax.random.normal(k_b, (C2,), jnp.float32)
    gamma = 1.0 + 0.1 * jax.random.normal(k_g, (C2,), jnp.float32)
    beta = 0.1 * jax.random.normal(k_be, (C2,), jnp.float32)
    running_mean = 0.1 * jax.random.normal(k_m, (C2,), jnp.float32)
    running_var = jnp.abs(jax.random.normal(k_v, (C2,), jnp.float32)) + 0.5

    out = conv_bn_act(x, w, b, gamma, beta, running_mean, running_var,
                      stride=S, padding=P, dilation=D, groups=G, act=True)
    out = jax.block_until_ready(out)

    ref = _reference(x, w, b, gamma, beta, running_mean, running_var,
                     S, P, D, act=True)
    assert out.shape == (N, C2, H, W), out.shape
    assert jnp.allclose(out, ref, atol=1e-4, rtol=1e-4), (
        float(jnp.max(jnp.abs(out - ref))))
    print("KERNEL_OK")
</pallas_src>

<mosaic_0001>
module attributes {stable_mosaic.version = 11 : i64} {
  func.func @_conv_bn_act_kernel(%arg0: i32, %arg1: memref<4x768xf32, #tpu.memory_space<vmem>>, %arg2: memref<8x36xf32, #tpu.memory_space<vmem>>, %arg3: memref<8x1xf32, #tpu.memory_space<vmem>>, %arg4: memref<2x8x384xf32, #tpu.memory_space<vmem>>, %arg5: memref<36x768xf32, #tpu.memory_space<vmem>>) attributes {dimension_semantics = [#tpu.dimension_semantics<arbitrary>], iteration_bounds = array<i64: 1>, scalar_prefetch = 0 : i64, scratch_operands = 1 : i64, tpu.core_type = #tpu.core_type<tc>, window_params = [{pipeline_mode = #tpu.pipeline_mode<synchronous>, transform_indices = @transform_0, window_bounds = array<i64: 4, 768>}, {pipeline_mode = #tpu.pipeline_mode<synchronous>, transform_indices = @transform_1, window_bounds = array<i64: 8, 36>}, {pipeline_mode = #tpu.pipeline_mode<synchronous>, transform_indices = @transform_2, window_bounds = array<i64: 8, 1>}, {pipeline_mode = #tpu.pipeline_mode<synchronous>, transform_indices = @transform_3, window_bounds = array<i64: 2, 8, 384>}]} {
    %c0 = arith.constant 0 : index
    %c0_0 = arith.constant 0 : index
    %0 = vector.load %arg1[%c0, %c0_0] : memref<4x768xf32, #tpu.memory_space<vmem>>, vector<4x768xf32>
    %c0_1 = arith.constant 0 : index
    %c0_2 = arith.constant 0 : index
    %1 = vector.load %arg5[%c0_1, %c0_2] : memref<36x768xf32, #tpu.memory_space<vmem>>, vector<4x768xf32>
    tpu.vector_store %arg5[%c0_1, %c0_2], %0 {strides = array<i32>} : memref<36x768xf32, #tpu.memory_space<vmem>>, vector<4x768xf32>,
    %c767_i32 = arith.constant 767 : i32
    %2 = tpu.dynamic_rotate %0 by %c767_i32 dim 1 : vector<4x768xf32>, i32 -> vector<4x768xf32>
    %c4 = arith.constant 4 : index
    %c0_3 = arith.constant 0 : index
    %3 = vector.load %arg5[%c4, %c0_3] : memref<36x768xf32, #tpu.memory_space<vmem>>, vector<4x768xf32>
    tpu.vector_store %arg5[%c4, %c0_3], %2 {strides = array<i32>} : memref<36x768xf32, #tpu.memory_space<vmem>>, vector<4x768xf32>,
    %c766_i32 = arith.constant 766 : i32
    %4 = tpu.dynamic_rotate %0 by %c766_i32 dim 1 : vector<4x768xf32>, i32 -> vector<4x768xf32>
    %c8 = arith.constant 8 : index
    %c0_4 = arith.constant 0 : index
    %5 = vector.load %arg5[%c8, %c0_4] : memref<36x768xf32, #tpu.memory_space<vmem>>, vector<4x768xf32>
    tpu.vector_store %arg5[%c8, %c0_4], %4 {strides = array<i32>} : memref<36x768xf32, #tpu.memory_space<vmem>>, vector<4x768xf32>,
    %c750_i32 = arith.constant 750 : i32
    %6 = tpu.dynamic_rotate %0 by %c750_i32 dim 1 : vector<4x768xf32>, i32 -> vector<4x768xf32>
    %c12 = arith.constant 12 : index
    %c0_5 = arith.constant 0 : index
    %7 = vector.load %arg5[%c12, %c0_5] : memref<36x768xf32, #tpu.memory_space<vmem>>, vector<4x768xf32>
    tpu.vector_store %arg5[%c12, %c0_5], %6 {strides = array<i32>} : memref<36x768xf32, #tpu.memory_space<vmem>>, vector<4x768xf32>,
    %c749_i32 = arith.constant 749 : i32
    %8 = tpu.dynamic_rotate %0 by %c749_i32 dim 1 : vector<4x768xf32>, i32 -> vector<4x768xf32>
    %c16 = arith.constant 16 : index
    %c0_6 = arith.constant 0 : index
    %9 = vector.load %arg5[%c16, %c0_6] : memref<36x768xf32, #tpu.memory_space<vmem>>, vector<4x768xf32>
    tpu.vector_store %arg5[%c16, %c0_6], %8 {strides = array<i32>} : memref<36x768xf32, #tpu.memory_space<vmem>>, vector<4x768xf32>,
    %c748_i32 = arith.constant 748 : i32
    %10 = tpu.dynamic_rotate %0 by %c748_i32 dim 1 : vector<4x768xf32>, i32 -> vector<4x768xf32>
    %c20 = arith.constant 20 : index
    %c0_7 = arith.constant 0 : index
    %11 = vector.load %arg5[%c20, %c0_7] : memref<36x768xf32, #tpu.memory_space<vmem>>, vector<4x768xf32>
    tpu.vector_store %arg5[%c20, %c0_7], %10 {strides = array<i32>} : memref<36x768xf32, #tpu.memory_space<vmem>>, vector<4x768xf32>,
    %c732_i32 = arith.constant 732 : i32
    %12 = tpu.dynamic_rotate %0 by %c732_i32 dim 1 : vector<4x768xf32>, i32 -> vector<4x768xf32>
    %c24 = arith.constant 24 : index
    %c0_8 = arith.constant 0 : index
    %13 = vector.load %arg5[%c24, %c0_8] : memref<36x768xf32, #tpu.memory_space<vmem>>, vector<4x768xf32>
    tpu.vector_store %arg5[%c24, %c0_8], %12 {strides = array<i32>} : memref<36x768xf32, #tpu.memory_space<vmem>>, vector<4x768xf32>,
    %c731_i32 = arith.constant 731 : i32
    %14 = tpu.dynamic_rotate %0 by %c731_i32 dim 1 : vector<4x768xf32>, i32 -> vector<4x768xf32>
    %c28 = arith.constant 28 : index
    %c0_9 = arith.constant 0 : index
    %15 = vector.load %arg5[%c28, %c0_9] : memref<36x768xf32, #tpu.memory_space<vmem>>, vector<4x768xf32>
    tpu.vector_store %arg5[%c28, %c0_9], %14 {strides = array<i32>} : memref<36x768xf32, #tpu.memory_space<vmem>>, vector<4x768xf32>,
    %c730_i32 = arith.constant 730 : i32
    %16 = tpu.dynamic_rotate %0 by %c730_i32 dim 1 : vector<4x768xf32>, i32 -> vector<4x768xf32>
    %c32 = arith.constant 32 : index
    %c0_10 = arith.constant 0 : index
    %17 = vector.load %arg5[%c32, %c0_10] : memref<36x768xf32, #tpu.memory_space<vmem>>, vector<4x768xf32>
    tpu.vector_store %arg5[%c32, %c0_10], %16 {strides = array<i32>} : memref<36x768xf32, #tpu.memory_space<vmem>>, vector<4x768xf32>,
    %c0_11 = arith.constant 0 : index
    %c0_12 = arith.constant 0 : index
    %18 = vector.load %arg2[%c0_11, %c0_12] : memref<8x36xf32, #tpu.memory_space<vmem>>, vector<8x36xf32>
    %c0_13 = arith.constant 0 : index
    %c0_14 = arith.constant 0 : index
    %19 = vector.load %arg5[%c0_13, %c0_14] : memref<36x768xf32, #tpu.memory_space<vmem>>, vector<36x768xf32>
    %cst = arith.constant dense<0.000000e+00> : vector<8x768xf32>
    %20 = tpu.matmul %18, %19, %cst {dimension_numbers = #tpu.dot_dimension_numbers<[1], [0], [0], [1], [0, 0, 1, 1], [], []>} : vector<8x36xf32>, vector<36x768xf32>, vector<8x768xf32> -> vector<8x768xf32>
    %c0_15 = arith.constant 0 : index
    %c0_16 = arith.constant 0 : index
    %21 = vector.load %arg3[%c0_15, %c0_16] : memref<8x1xf32, #tpu.memory_space<vmem>>, vector<8x1xf32>
    %22 = vector.broadcast %21 : vector<8x1xf32> to vector<8x768xf32>
    %23 = arith.addf %20, %22 : vector<8x768xf32>
    %cst_17 = arith.constant 0.000000e+00 : f32
    %24 = vector.broadcast %cst_17 : f32 to vector<8x768xf32>
    %25 = arith.cmpf ogt, %23, %24 : vector<8x768xf32>
    %cst_18 = arith.constant 1.000000e-01 : f32
    %26 = vector.broadcast %cst_18 : f32 to vector<8x768xf32>
    %27 = arith.mulf %26, %23 : vector<8x768xf32>
    %28 = arith.select %25, %23, %27 : vector<8x768xi1>, vector<8x768xf32>
    %29 = vector.extract_strided_slice %28 {offsets = [0, 0], sizes = [8, 384], strides = [1, 1]} : vector<8x768xf32> to vector<8x384xf32>
    %c0_19 = arith.constant 0 : index
    %c0_20 = arith.constant 0 : index
    %c0_21 = arith.constant 0 : index
    %30 = vector.load %arg4[%c0_19, %c0_20, %c0_21] : memref<2x8x384xf32, #tpu.memory_space<vmem>>, vector<1x8x384xf32>
    %31 = vector.shape_cast %30 : vector<1x8x384xf32> to vector<8x384xf32>
    %32 = vector.shape_cast %29 : vector<8x384xf32> to vector<1x8x384xf32>
    tpu.vector_store %arg4[%c0_19, %c0_20, %c0_21], %32 {strides = array<i32>} : memref<2x8x384xf32, #tpu.memory_space<vmem>>, vector<1x8x384xf32>,
    %33 = vector.extract_strided_slice %28 {offsets = [0, 384], sizes = [8, 384], strides = [1, 1]} : vector<8x768xf32> to vector<8x384xf32>
    %c1 = arith.constant 1 : index
    %c0_22 = arith.constant 0 : index
    %c0_23 = arith.constant 0 : index
    %34 = vector.load %arg4[%c1, %c0_22, %c0_23] : memref<2x8x384xf32, #tpu.memory_space<vmem>>, vector<1x8x384xf32>
    %35 = vector.shape_cast %34 : vector<1x8x384xf32> to vector<8x384xf32>
    %36 = vector.shape_cast %33 : vector<8x384xf32> to vector<1x8x384xf32>
    tpu.vector_store %arg4[%c1, %c0_22, %c0_23], %36 {strides = array<i32>} : memref<2x8x384xf32, #tpu.memory_space<vmem>>, vector<1x8x384xf32>,
    return
  }
  func.func @transform_0(%arg0: i32) -> (i32, i32) {
    %c0_i32 = arith.constant 0 : i32
    %c0_i32_0 = arith.constant 0 : i32
    %c0_i32_1 = arith.constant 0 : i32
    return %c0_i32, %c0_i32_0 : i32, i32
  }
  func.func @transform_1(%arg0: i32) -> (i32, i32) {
    %c0_i32 = arith.constant 0 : i32
    %c0_i32_0 = arith.constant 0 : i32
    %c0_i32_1 = arith.constant 0 : i32
    return %c0_i32, %c0_i32_0 : i32, i32
  }
  func.func @transform_2(%arg0: i32) -> (i32, i32) {
    %c0_i32 = arith.constant 0 : i32
    %c0_i32_0 = arith.constant 0 : i32
    %c0_i32_1 = arith.constant 0 : i32
    return %c0_i32, %c0_i32_0 : i32, i32
  }
  func.func @transform_3(%arg0: i32) -> (i32, i32, i32) {
    %c0_i32 = arith.constant 0 : i32
    %c0_i32_0 = arith.constant 0 : i32
    %c0_i32_1 = arith.constant 0 : i32
    %c0_i32_2 = arith.constant 0 : i32
    return %c0_i32, %c0_i32_0, %c0_i32_1 : i32, i32, i32
  }
}

</mosaic_0001>

<bundles_post_ra>
// kernel: tpu_custom_call.1
= control target key start
LH: loop header
LB: loop body
LE: loop exit
PB: predicated region body
PF: predicated region fallthrough
CT: control target
= control target key end

     0   :  { %8 = vsyncpa [#allocation4], 0  ;;  %s1108_s0 = inlined_call_operand.hbm [shape: f32[4,768], index: 0, kind: input, shape index: {}]   ;;  %s1109_s1 = inlined_call_operand.vmem [shape: f32[8,36], index: 1, kind: input, shape index: {}]   ;;  %s1110_s2 = inlined_call_operand.vmem [shape: f32[8,1], index: 2, kind: input, shape index: {}]   ;;  %s1111_s3 = inlined_call_operand.hbm [shape: f32[2,8,384], index: 3, kind: output, shape index: {}]  }
   0x1   :  { %9 = vsyncpa [#allocation5], 0  ;;  %s15_s14 = sshll.u32 %s1108_s0, 4  ;;  %s770_s15 = smov [#allocation3]   ;;  %s16_s14 = int_to_ptr.hbm [resolvable:$true] %s15_s14 }
   0x2   :  { %s17_s16 = sshll.u32 %s770_s15, 4  ;;  %s18_s16 = int_to_ptr.vmem [resolvable:$true] %s17_s16 }
   0x3   :  { %20 = dma.hbm_to_vmem [thread:$0]  %s16_s14, 384, %s18_s16, [#allocation4]  }
   0x4   :  { %766 = dma.done.wait [#allocation4], 384  }
   0x5   :  { %767 = vsyncadd [#allocation4], 4294966912  ;;  %v806_v0 = vld [vmem:[#allocation3 + $0x8] sm:$0xff]  ;;  %v808_v1 = vld [vmem:[#allocation3] sm:$0xff]  ;;  %s771_s0 = smov 127   ;;  %s772_s17 = smov 126   ;;  %v87_v59 = vlaneseq }
   0x6   :  { %v810_v2 = vld [vmem:[#allocation3 + $0x10] sm:$0xff]  ;;  %37 = vst [vmem:[#allocation1 + $0x10] ss:$2 sm:$0xff] %v806_v0  ;;  %s773_s18 = smov 110   ;;  %s774_s19 = smov 109   ;;  %vm509_vm7 = vcmask 1043456  }
   0x7   :  { %35 = vst [vmem:[#allocation1] ss:$2 sm:$0xff] %v808_v1  ;;  %s775_s20 = smov 108   ;;  %s776_s21 = smov 92   ;;  %v899_v61 = vand.u32 127, %v87_v59  ;;  %vm505_vm9 = vcmask 293888  }
   0x8   :  { %39 = vst [vmem:[#allocation1 + $0x20] ss:$2 sm:$0xff] %v810_v2  ;;  %s777_s22 = smov 91   ;;  %s778_s23 = smov 90  }
   0x9   :  { %vm89_vm0 = vcmp.lt.s32.totalorder %v899_v61, 127  ;;  %vm149_vm1 = vcmp.lt.s32.totalorder %v899_v61, 126  ;;  %vm191_vm2 = vcmp.lt.s32.totalorder %v899_v61, 110  ;;  %vm251_vm3 = vcmp.lt.s32.totalorder %v899_v61, 109  ;;  %s679_s30 = sshll.u32 %s1111_s3, 4  ;;  %s781_s4 = smov 384   ;;  %s680_s30 = int_to_ptr.hbm [resolvable:$true] %s679_s30 }
   0xa   :  { %vm293_vm4 = vcmp.lt.s32.totalorder %v899_v61, 108  ;;  %vm353_vm5 = vcmp.lt.s32.totalorder %v899_v61, 92  ;;  %vm455_vm6 = vcmp.lt.s32.totalorder %v899_v61, 90  ;;  %vm395_vm8 = vcmp.lt.s32.totalorder %v899_v61, 91  ;;  %s782_s5 = smov 24  }
   0xd   :  { %v42_v3 = vld.sshfl [vmem:[#allocation1 + $0x10] sm:$0xff pattern:$0x75316420]  ;;  %v43_v4 = vld.sshfl [vmem:[#allocation1 + $0x18] sm:$0xff pattern:$0x75316420] }
   0xe   :  { %60 = vst [vmem:[#allocation1 + $0x10] ss:$2 sm:$0xff] %v806_v0  ;;  %v40_v5 = vld.sshfl [vmem:[#allocation1] sm:$0xff pattern:$0x75316420] }
   0xf   :  { %54 = vst [vmem:[#allocation2 + $0xd8] sm:$0xf] %v42_v3  ;;  %v41_v6 = vld.sshfl [vmem:[#allocation1 + $0x8] sm:$0xff pattern:$0x75316420] }
  0x10   :  { %55 = vst [vmem:[#allocation2 + $0x18] sm:$0xf] %v43_v4  ;;  %v44_v7 = vld.sshfl [vmem:[#allocation1 + $0x20] sm:$0xff pattern:$0x75316420] }
  0x11   :  { %58 = vst [vmem:[#allocation1] ss:$2 sm:$0xff] %v808_v1  ;;  %v45_v8 = vld.sshfl [vmem:[#allocation1 + $0x28] sm:$0xff pattern:$0x75316420] }
  0x12   :  { %52 = vst [vmem:[#allocation2 + $0xb0] sm:$0xf] %v40_v5 }
  0x13   :  { %53 = vst [vmem:[#allocation2] sm:$0xf] %v41_v6 }
  0x14   :  { %62 = vst [vmem:[#allocation1 + $0x20] ss:$2 sm:$0xff] %v810_v2 }
  0x15   :  { %v65_v9 = vld.sshfl [vmem:[#allocation1 + $0x10] sm:$0xff pattern:$0x75316420]  ;;  %v818_v10 = vld.sshfl [vmem:[#allocation1 + $0x18] sm:$0xff pattern:$0x75316420] }
  0x16   :  { %79 = vrot.lane.b32.xlu1 %v65_v9, %s771_s0  ;;  %122 = vst [vmem:[#allocation1 + $0x10] ss:$2 sm:$0xff] %v806_v0 }
  0x17   :  { %56 = vst [vmem:[#allocation2 + $0x50] sm:$0xf] %v44_v7 }
  0x18   :  { %v64_v11 = vld.sshfl [vmem:[#allocation1 + $0x8] sm:$0xff pattern:$0x75316420]  ;;  %v63_v12 = vld.sshfl [vmem:[#allocation1] sm:$0xff pattern:$0x75316420] }
  0x19   :  { %77 = vrot.lane.b32.xlu0 %v64_v11, %s771_s0  ;;  %75 = vrot.lane.b32.xlu2 %v63_v12, %s771_s0  ;;  %120 = vst [vmem:[#allocation1] ss:$2 sm:$0xff] %v808_v1 }
  0x1a   :  { %57 = vst [vmem:[#allocation2 + $0x68] sm:$0xf] %v45_v8 }
  0x1b   :  { %v825_v13 = vld.sshfl [vmem:[#allocation1 + $0x20] sm:$0xff pattern:$0x75316420]  ;;  %v827_v14 = vld.sshfl [vmem:[#allocation1 + $0x28] sm:$0xff pattern:$0x75316420] }
  0x1c   :  { %124 = vst [vmem:[#allocation1 + $0x20] ss:$2 sm:$0xff] %v810_v2 }
  0x1d   :  { %v127_v15 = vld.sshfl [vmem:[#allocation1 + $0x10] sm:$0xff pattern:$0x75316420]  ;;  %v830_v16 = vld.sshfl [vmem:[#allocation1 + $0x18] sm:$0xff pattern:$0x75316420] }
  0x1e   :  { %141 = vrot.lane.b32.xlu1 %v127_v15, %s772_s17  ;;  %164 = vst [vmem:[#allocation1 + $0x10] ss:$2 sm:$0xff] %v806_v0 }
  0x20   :  { %v126_v17 = vld.sshfl [vmem:[#allocation1 + $0x8] sm:$0xff pattern:$0x75316420]  ;;  %v125_v18 = vld.sshfl [vmem:[#allocation1] sm:$0xff pattern:$0x75316420] }
  0x21   :  { %139 = vrot.lane.b32.xlu0 %v126_v17, %s772_s17  ;;  %137 = vrot.lane.b32.xlu2 %v125_v18, %s772_s17  ;;  %162 = vst [vmem:[#allocation1] ss:$2 sm:$0xff] %v808_v1 }
  0x23   :  { %v837_v19 = vld.sshfl [vmem:[#allocation1 + $0x20] sm:$0xff pattern:$0x75316420]  ;;  %v839_v20 = vld.sshfl [vmem:[#allocation1 + $0x28] sm:$0xff pattern:$0x75316420] }
  0x24   :  { %166 = vst [vmem:[#allocation1 + $0x20] ss:$2 sm:$0xff] %v810_v2 }
  0x25   :  { %v170_v21 = vld.sshfl [vmem:[#allocation1 + $0x18] sm:$0xff pattern:$0x75316420]  ;;  %v169_v22 = vld.sshfl [vmem:[#allocation1 + $0x10] sm:$0xff pattern:$0x75316420] }
  0x26   :  { %224 = vst [vmem:[#allocation1 + $0x10] ss:$2 sm:$0xff] %v806_v0 }
  0x28   :  { %v168_v23 = vld.sshfl [vmem:[#allocation1 + $0x8] sm:$0xff pattern:$0x75316420]  ;;  %v167_v24 = vld.sshfl [vmem:[#allocation1] sm:$0xff pattern:$0x75316420] }
  0x29   :  { %183 = vrot.lane.b32.xlu0 %v169_v22, %s773_s18  ;;  %181 = vrot.lane.b32.xlu2 %v168_v23, %s773_s18  ;;  %222 = vst [vmem:[#allocation1] ss:$2 sm:$0xff] %v808_v1 }
  0x2a   :  { %179 = vrot.lane.b32.xlu1 %v167_v24, %s773_s18 }
  0x2b   :  { %v847_v25 = vld.sshfl [vmem:[#allocation1 + $0x20] sm:$0xff pattern:$0x75316420]  ;;  %v849_v26 = vld.sshfl [vmem:[#allocation1 + $0x28] sm:$0xff pattern:$0x75316420] }
  0x2c   :  { %226 = vst [vmem:[#allocation1 + $0x20] ss:$2 sm:$0xff] %v810_v2 }
  0x2d   :  { %v229_v27 = vld.sshfl [vmem:[#allocation1 + $0x10] sm:$0xff pattern:$0x75316420]  ;;  %v852_v28 = vld.sshfl [vmem:[#allocation1 + $0x18] sm:$0xff pattern:$0x75316420] }
  0x2e   :  { %266 = vst [vmem:[#allocation1 + $0x10] ss:$2 sm:$0xff] %v806_v0 }
  0x30   :  { %v227_v29 = vld.sshfl [vmem:[#allocation1] sm:$0xff pattern:$0x75316420]  ;;  %v228_v30 = vld.sshfl [vmem:[#allocation1 + $0x8] sm:$0xff pattern:$0x75316420] }
  0x31   :  { %243 = vrot.lane.b32.xlu0 %v229_v27, %s774_s19  ;;  %185 = vrot.lane.b32.xlu2 %v170_v21, %s773_s18  ;;  %264 = vst [vmem:[#allocation1] ss:$2 sm:$0xff] %v808_v1 }
  0x32   :  { %239 = vrot.lane.b32.xlu1 %v227_v29, %s774_s19 }
  0x33   :  { %v231_v31 = vld.sshfl [vmem:[#allocation1 + $0x20] sm:$0xff pattern:$0x75316420]  ;;  %v859_v32 = vld.sshfl [vmem:[#allocation1 + $0x28] sm:$0xff pattern:$0x75316420] }
  0x34   :  { %268 = vst [vmem:[#allocation1 + $0x20] ss:$2 sm:$0xff] %v810_v2 }
  0x35   :  { %v271_v33 = vld.sshfl [vmem:[#allocation1 + $0x10] sm:$0xff pattern:$0x75316420]  ;;  %v272_v34 = vld.sshfl [vmem:[#allocation1 + $0x18] sm:$0xff pattern:$0x75316420] }
  0x36   :  { %326 = vst [vmem:[#allocation1 + $0x10] ss:$2 sm:$0xff] %v806_v0 }
  0x38   :  { %v270_v35 = vld.sshfl [vmem:[#allocation1 + $0x8] sm:$0xff pattern:$0x75316420]  ;;  %v269_v36 = vld.sshfl [vmem:[#allocation1] sm:$0xff pattern:$0x75316420] }
  0x39   :  { %241 = vrot.lane.b32.xlu2 %v228_v30, %s774_s19  ;;  %281 = vrot.lane.b32.xlu0 %v269_v36, %s775_s20  ;;  %324 = vst [vmem:[#allocation1] ss:$2 sm:$0xff] %v808_v1 }
  0x3a   :  { %283 = vrot.lane.b32.xlu1 %v270_v35, %s775_s20 }
  0x3b   :  { %v273_v37 = vld.sshfl [vmem:[#allocation1 + $0x20] sm:$0xff pattern:$0x75316420]  ;;  %v274_v38 = vld.sshfl [vmem:[#allocation1 + $0x28] sm:$0xff pattern:$0x75316420] }
  0x3c   :  { %328 = vst [vmem:[#allocation1 + $0x20] ss:$2 sm:$0xff] %v810_v2 }
  0x3d   :  { %v332_v39 = vld.sshfl [vmem:[#allocation1 + $0x18] sm:$0xff pattern:$0x75316420]  ;;  %v331_v40 = vld.sshfl [vmem:[#allocation1 + $0x10] sm:$0xff pattern:$0x75316420] }
  0x3e   :  { %368 = vst [vmem:[#allocation1 + $0x10] ss:$2 sm:$0xff] %v806_v0 }
  0x40   :  { %v329_v41 = vld.sshfl [vmem:[#allocation1] sm:$0xff pattern:$0x75316420]  ;;  %v330_v42 = vld.sshfl [vmem:[#allocation1 + $0x8] sm:$0xff pattern:$0x75316420] }
  0x41   :  { %285 = vrot.lane.b32.xlu2 %v271_v33, %s775_s20  ;;  %341 = vrot.lane.b32.xlu0 %v329_v41, %s776_s21  ;;  %366 = vst [vmem:[#allocation1] ss:$2 sm:$0xff] %v808_v1 }
  0x42   :  { %287 = vrot.lane.b32.xlu1 %v272_v34, %s775_s20 }
  0x43   :  { %v333_v43 = vld.sshfl [vmem:[#allocation1 + $0x20] sm:$0xff pattern:$0x75316420]  ;;  %v334_v44 = vld.sshfl [vmem:[#allocation1 + $0x28] sm:$0xff pattern:$0x75316420] }
  0x44   :  { %370 = vst [vmem:[#allocation1 + $0x20] ss:$2 sm:$0xff] %v810_v2 }
  0x45   :  { %v373_v45 = vld.sshfl [vmem:[#allocation1 + $0x10] sm:$0xff pattern:$0x75316420]  ;;  %v374_v46 = vld.sshfl [vmem:[#allocation1 + $0x18] sm:$0xff pattern:$0x75316420] }
  0x46   :  { %428 = vst [vmem:[#allocation1 + $0x10] ss:$2 sm:$0xff] %v806_v0 }
  0x48   :  { %v371_v47 = vld.sshfl [vmem:[#allocation1] sm:$0xff pattern:$0x75316420]  ;;  %v372_v48 = vld.sshfl [vmem:[#allocation1 + $0x8] sm:$0xff pattern:$0x75316420] }
  0x49   :  { %289 = vrot.lane.b32.xlu2 %v273_v37, %s775_s20  ;;  %347 = vrot.lane.b32.xlu0 %v332_v39, %s776_s21  ;;  %426 = vst [vmem:[#allocation1] ss:$2 sm:$0xff] %v808_v1 }
  0x4a   :  { %343 = vrot.lane.b32.xlu1 %v330_v42, %s776_s21 }
  0x4b   :  { %v375_v49 = vld.sshfl [vmem:[#allocation1 + $0x20] sm:$0xff pattern:$0x75316420]  ;;  %v376_v50 = vld.sshfl [vmem:[#allocation1 + $0x28] sm:$0xff pattern:$0x75316420] }
  0x4c   :  { %430 = vst [vmem:[#allocation1 + $0x20] ss:$2 sm:$0xff] %v810_v2 }
  0x4d   :  { %v433_v52 = vld.sshfl [vmem:[#allocation1 + $0x10] sm:$0xff pattern:$0x75316420]  ;;  %v434_v54 = vld.sshfl [vmem:[#allocation1 + $0x18] sm:$0xff pattern:$0x75316420] }
  0x50   :  { %v432_v51 = vld.sshfl [vmem:[#allocation1 + $0x8] sm:$0xff pattern:$0x75316420]  ;;  %v431_v55 = vld.sshfl [vmem:[#allocation1] sm:$0xff pattern:$0x75316420] }
  0x51   :  { %345 = vrot.lane.b32.xlu2 %v331_v40, %s776_s21  ;;  %383 = vrot.lane.b32.xlu0 %v371_v47, %s777_s22 }
  0x52   :  { %349 = vrot.lane.b32.xlu1 %v333_v43, %s776_s21 }
  0x53   :  { %v435_v53 = vld.sshfl [vmem:[#allocation1 + $0x20] sm:$0xff pattern:$0x75316420]  ;;  %v436_v58 = vld.sshfl [vmem:[#allocation1 + $0x28] sm:$0xff pattern:$0x75316420] }
  0x59   :  { %385 = vrot.lane.b32.xlu0 %v372_v48, %s777_s22  ;;  %445 = vrot.lane.b32.xlu2 %v432_v51, %s778_s23 }
  0x5a   :  { %387 = vrot.lane.b32.xlu1 %v373_v45, %s777_s22 }
  0x61   :  { %389 = vrot.lane.b32.xlu0 %v374_v46, %s777_s22  ;;  %447 = vrot.lane.b32.xlu2 %v433_v52, %s778_s23 }
  0x62   :  { %391 = vrot.lane.b32.xlu1 %v375_v49, %s777_s22 }
  0x69   :  { %451 = vrot.lane.b32.xlu0 %v435_v53, %s778_s23  ;;  %449 = vrot.lane.b32.xlu2 %v434_v54, %s778_s23 }
  0x6a   :  { %443 = vrot.lane.b32.xlu1 %v431_v55, %s778_s23 }
  0x71   :  { %187 = vrot.lane.b32.xlu0 %v847_v25, %s773_s18  ;;  %247 = vrot.lane.b32.xlu2 %v231_v31, %s774_s19 }
  0x72   :  { %245 = vrot.lane.b32.xlu1 %v852_v28, %s774_s19 }
  0x73   :  { %v887_v56 = vpop.permute.xlu2 %75 }
  0x79   :  { %81 = vrot.lane.b32.xlu0 %v818_v10, %s771_s0  ;;  %143 = vrot.lane.b32.xlu2 %v830_v16, %s772_s17 }
  0x7a   :  { %83 = vrot.lane.b32.xlu1 %v825_v13, %s771_s0 }
  0x7b   :  { %v895_v57 = vpop.permute.xlu2 %137 }
  0x81   :  { %145 = vrot.lane.b32.xlu0 %v837_v19, %s772_s17  ;;  %453 = vrot.lane.b32.xlu2 %v436_v58, %s778_s23 }
  0x82   :  { %393 = vrot.lane.b32.xlu1 %v376_v50, %s777_s22 }
  0x83   :  { %v182_v60 = vpop.permute.xlu2 %181 }
  0x88   :  { %v901_v62 = vpop.permute.xlu1 %79 }
  0x89   :  { %291 = vrot.lane.b32.xlu0 %v274_v38, %s775_s20  ;;  %189 = vrot.lane.b32.xlu2 %v849_v26, %s773_s18 }
  0x8a   :  { %351 = vrot.lane.b32.xlu1 %v334_v44, %s776_s21 }
  0x8b   :  { %v78_v63 = vpop.permute.xlu0 %77  ;;  %v908_v0 = vpop.permute.xlu2 %185 }
  0x8c   :  { %v93_v1 = vsel %vm89_vm0, %v78_v63, %v901_v62  ;;  %v94_v2 = vsel %vm89_vm0, %v887_v56, %v78_v63 }
  0x8d   :  { %v102_v3 = vrot.slane %v94_v2, 4  ;;  %v103_v4 = vrot.slane %v93_v1, 4 }
  0x8f   :  { %114 = vst [vmem:[#allocation2 + $0xb0] sm:$0xf0] %v102_v3 }
  0x90   :  { %115 = vst [vmem:[#allocation2] sm:$0xf0] %v103_v4  ;;  %v920_v5 = vpop.permute.xlu1 %141 }
  0x91   :  { %249 = vrot.lane.b32.xlu0 %v859_v32, %s774_s19  ;;  %147 = vrot.lane.b32.xlu2 %v839_v20, %s772_s17 }
  0x92   :  { %85 = vrot.lane.b32.xlu1 %v827_v14, %s771_s0 }
  0x93   :  { %v140_v6 = vpop.permute.xlu0 %139  ;;  %v242_v7 = vpop.permute.xlu2 %241 }
  0x94   :  { %v153_v8 = vsel %vm149_vm1, %v140_v6, %v920_v5  ;;  %v154_v9 = vsel %vm149_vm1, %v895_v57, %v140_v6 }
  0x95   :  { %156 = vst [vmem:[#allocation2 + $0x30] sm:$0xf] %v154_v9 }
  0x96   :  { %157 = vst [vmem:[#allocation2 + $0x48] sm:$0xf] %v153_v8 }
  0x9b   :  { %v184_v10 = vpop.permute.xlu0 %183  ;;  %v286_v11 = vpop.permute.xlu2 %285 }
  0x9c   :  { %v194_v12 = vsel %vm191_vm2, %v184_v10, %v908_v0  ;;  %v195_v13 = vsel %vm191_vm2, %v182_v60, %v184_v10  ;;  %v937_v14 = vpop.permute.xlu1 %179 }
  0x9d   :  { %v205_v15 = vrot.slane %v195_v13, 4  ;;  %v206_v16 = vrot.slane %v194_v12, 4  ;;  %v196_v17 = vsel %vm191_vm2, %v937_v14, %v182_v60 }
  0x9e   :  { %v204_v18 = vrot.slane %v196_v17, 4 }
  0x9f   :  { %217 = vst [vmem:[#allocation2 + $0x48] sm:$0xf0] %v205_v15 }
  0xa0   :  { %218 = vst [vmem:[#allocation2 + $0x80] sm:$0xf0] %v206_v16 }
  0xa1   :  { %216 = vst [vmem:[#allocation2 + $0x30] sm:$0xf0] %v204_v18 }
  0xa3   :  { %v943_v19 = vpop.permute.xlu0 %243  ;;  %v945_v20 = vpop.permute.xlu2 %289 }
  0xa4   :  { %v255_v21 = vsel %vm251_vm3, %v242_v7, %v943_v19  ;;  %v950_v22 = vpop.permute.xlu1 %239 }
  0xa5   :  { %259 = vst [vmem:[#allocation2 + $0xa8] sm:$0xf] %v255_v21  ;;  %v256_v23 = vsel %vm251_vm3, %v950_v22, %v242_v7  ;;  %v470_v21 = vld [vmem:[#allocation2] sm:$0xff] }
  0xa6   :  { %258 = vst [vmem:[#allocation2 + $0x60] sm:$0xf] %v256_v23  ;;  %v476_v12 = vld [vmem:[#allocation2 + $0x48] sm:$0xff] }
  0xab   :  { %v346_v24 = vpop.permute.xlu2 %345  ;;  %v956_v25 = vpop.permute.xlu0 %281 }
  0xac   :  { %v284_v26 = vpop.permute.xlu1 %283 }
  0xad   :  { %v297_v27 = vsel %vm293_vm4, %v284_v26, %v286_v11  ;;  %v298_v28 = vsel %vm293_vm4, %v956_v25, %v284_v26 }
  0xae   :  { %v307_v29 = vrot.slane %v297_v27, 4  ;;  %v306_v30 = vrot.slane %v298_v28, 4 }
  0xb0   :  { %319 = vst [vmem:[#allocation2 + $0xa8] sm:$0xf0] %v307_v29 }
  0xb1   :  { %318 = vst [vmem:[#allocation2 + $0x60] sm:$0xf0] %v306_v30 }
  0xb3   :  { %v963_v31 = vpop.permute.xlu0 %341  ;;  %v965_v32 = vpop.permute.xlu2 %445 }
  0xb4   :  { %v288_v33 = vpop.permute.xlu1 %287 }
  0xb5   :  { %v295_v34 = vsel %vm293_vm4, %v288_v33, %v945_v20  ;;  %v296_v35 = vsel %vm293_vm4, %v286_v11, %v288_v33 }
  0xb6   :  { %v308_v36 = vrot.slane %v296_v35, 4  ;;  %v309_v37 = vrot.slane %v295_v34, 4 }
  0xb7   :  { %v482_v10 = vld [vmem:[#allocation2 + $0xa8] sm:$0xff] }
  0xb8   :  { %320 = vst [vmem:[#allocation2 + $0x70] sm:$0xf0] %v308_v36 }
  0xb9   :  { %321 = vst [vmem:[#allocation2 + $0x40] sm:$0xf0] %v309_v37 }
  0xbb   :  { %v348_v38 = vpop.permute.xlu0 %347  ;;  %v448_v39 = vpop.permute.xlu2 %447 }
  0xbc   :  { %v344_v40 = vpop.permute.xlu1 %343  ;;  %v356_v41 = vsel %vm353_vm5, %v346_v24, %v348_v38  ;;  %v459_v44 = vsel %vm455_vm6, %v965_v32, %v448_v39 }
  0xbd   :  { %v357_v42 = vsel %vm353_vm5, %v344_v40, %v346_v24  ;;  %v358_v43 = vsel %vm353_vm5, %v963_v31, %v344_v40  ;;  %362 = vst [vmem:[#allocation2 + $0x38] sm:$0xf] %v356_v41  ;;  %v1045_v40 = vld [vmem:[%s1109_s1] sm:$0xff]  ;;  %v481_v41 = vld [vmem:[#allocation2 + $0x60] sm:$0xff] }
  0xbe   :  { %360 = vst [vmem:[#allocation2 + $0xc0] sm:$0xf] %v358_v43 }
  0xbf   :  { %361 = vst [vmem:[#allocation2 + $0x10] sm:$0xf] %v357_v42 }
  0xc0   :  { %463 = vst [vmem:[#allocation2 + $0xd0] sm:$0xf] %v459_v44 }
  0xc3   :  { %v984_v45 = vpop.permute.xlu0 %383  ;;  %v450_v46 = vpop.permute.xlu2 %449 }
  0xc4   :  { %v986_v47 = vpop.permute.xlu1 %349  ;;  %v458_v48 = vsel %vm455_vm6, %v448_v39, %v450_v46 }
  0xc5   :  { %v355_v49 = vsel %vm353_vm5, %v348_v38, %v986_v47  ;;  %464 = vst [vmem:[#allocation2 + $0x98] sm:$0xf] %v458_v48 }
  0xc6   :  { %363 = vst [vmem:[#allocation2 + $0x28] sm:$0xf] %v355_v49 }
  0xc7   :  { %v494_v50 = vld [vmem:[#allocation2 + $0xd0] sm:$0xf] }
  0xc8   :  { %694 = vmatpush.msk.msra.mxu1 %vm509_vm7, %v494_v50 }
  0xcb   :  { %v386_v51 = vpop.permute.xlu0 %385  ;;  %v995_v52 = vpop.permute.xlu2 %247 }
  0xcc   :  { %v388_v53 = vpop.permute.xlu1 %387  ;;  %v400_v54 = vsel %vm395_vm8, %v984_v45, %v386_v51  ;;  %v495_v55 = vld [vmem:[#allocation2 + $0x98] sm:$0xf] }
  0xcd   :  { %v399_v58 = vsel %vm395_vm8, %v386_v51, %v388_v53  ;;  %v408_v59 = vrot.slane %v400_v54, 4  ;;  %696 = vmatpush.msk.msra.mxu2 %vm509_vm7, %v495_v55  ;;  %v469_v54 = vld [vmem:[#allocation2 + $0xb0] sm:$0xff] }
  0xce   :  { %v409_v60 = vrot.slane %v399_v58, 4 }
  0xcf   :  { %420 = vst [vmem:[#allocation2 + $0xc0] sm:$0xf0] %v408_v59  ;;  %v779_v59 = vmov 0  }
  0xd0   :  { %421 = vst [vmem:[#allocation2 + $0x10] sm:$0xf0] %v409_v60  ;;  %717 = vset.pattern.permute.xlu0 %v779_v59  ;;  %v499_v60 = vld [vmem:[%s1110_s2] sm:$0xff]  ;;  %s780_s2 = smov [#allocation6]  }
  0xd1   :  { %502 = vperm.xlu0 %717, %v499_v60   ;;  %s677_s27 = sshll.u32 %s780_s2, 4  ;;  %s678_s27 = int_to_ptr.vmem [resolvable:$true] %s677_s27 }
  0xd3   :  { %v390_v63 = vpop.permute.xlu0 %389  ;;  %v1003_v1 = vpop.permute.xlu2 %143 }
  0xd4   :  { %v1005_v2 = vpop.permute.xlu1 %391  ;;  %v398_v3 = vsel %vm395_vm8, %v388_v53, %v390_v63  ;;  %v152_v4 = vsel %vm149_vm1, %v920_v5, %v1003_v1 }
  0xd5   :  { %v397_v6 = vsel %vm395_vm8, %v390_v63, %v1005_v2  ;;  %v410_v7 = vrot.slane %v398_v3, 4  ;;  %158 = vst [vmem:[#allocation2 + $0x80] sm:$0xf] %v152_v4 }
  0xd6   :  { %v411_v8 = vrot.slane %v397_v6, 4  ;;  %v487_v39 = vld [vmem:[#allocation2 + $0xc0] sm:$0xff] }
  0xd7   :  { %422 = vst [vmem:[#allocation2 + $0x38] sm:$0xf0] %v410_v7  ;;  %v488_v9 = vld [vmem:[#allocation2 + $0x10] sm:$0xff] }
  0xd8   :  { %423 = vst [vmem:[#allocation2 + $0x28] sm:$0xf0] %v411_v8  ;;  %560 = vmatpush.msra.mxu1 %v488_v9 }
  0xda   :  { %561 = vmatpush.msra.mxu1 %v482_v10 }
  0xdb   :  { %v452_v11 = vpop.permute.xlu0 %451  ;;  %v454_v13 = vpop.permute.xlu2 %453 }
  0xdc   :  { %v457_v15 = vsel %vm455_vm6, %v450_v46, %v452_v11  ;;  %562 = vmatpush.msra.mxu1 %v476_v12  ;;  %v456_v5 = vsel %vm455_vm6, %v452_v11, %v454_v13  ;;  %v444_v16 = vpop.permute.xlu1 %443  ;;  %v475_v46 = vld [vmem:[#allocation2 + $0x30] sm:$0xff] }
  0xdd   :  { %465 = vst [vmem:[#allocation2 + $0xc8] sm:$0xf] %v457_v15  ;;  %v460_v17 = vsel %vm455_vm6, %v444_v16, %v965_v32  ;;  %v461_v18 = vsel %vm455_vm6, %v454_v13, %v444_v16 }
  0xde   :  { %466 = vst [vmem:[#allocation2 + $0xe0] sm:$0xf] %v456_v5  ;;  %563 = vmatpush.msra.mxu1 %v470_v21  ;;  %v489_v23 = vld [vmem:[#allocation2 + $0x38] sm:$0xff] }
  0xdf   :  { %462 = vst [vmem:[#allocation2 + $0x58] sm:$0xf] %v460_v17  ;;  %580 = vmatpush.msra.mxu2 %v489_v23  ;;  %v490_v37 = vld [vmem:[#allocation2 + $0x28] sm:$0xff]  ;;  %695 = vmatmul.msk.f32.vlgmr.msra.gmra.mxu1 %vm505_vm9, %v1045_v40 }
  0xe0   :  { %467 = vst [vmem:[#allocation2 + $0x20] sm:$0xf] %v461_v18 }
  0xe3   :  { %v188_v24 = vpop.permute.xlu0 %187  ;;  %v190_v26 = vpop.permute.xlu2 %189 }
  0xe4   :  { %v193_v27 = vsel %vm191_vm2, %v908_v0, %v188_v24  ;;  %v192_v28 = vsel %vm191_vm2, %v188_v24, %v190_v26  ;;  %v197_v29 = vsel %vm191_vm2, %v190_v26, %v937_v14  ;;  %v246_v30 = vpop.permute.xlu1 %245  ;;  %v496_v32 = vld [vmem:[#allocation2 + $0xc8] sm:$0xf] }
  0xe5   :  { %v207_v33 = vrot.slane %v193_v27, 4  ;;  %v208_v34 = vrot.slane %v192_v28, 4  ;;  %v209_v35 = vrot.slane %v197_v29, 4  ;;  %v253_v36 = vsel %vm251_vm3, %v246_v30, %v995_v52  ;;  %698 = vmatpush.msk.msra.mxu3 %vm509_vm7, %v496_v32  ;;  %v497_v55 = vld [vmem:[#allocation2 + $0xe0] sm:$0xf] }
  0xe6   :  { %261 = vst [vmem:[#allocation2 + $0x40] sm:$0xf] %v253_v36  ;;  %v493_v0 = vld [vmem:[#allocation2 + $0x58] sm:$0xf]  ;;  %v254_v38 = vsel %vm251_vm3, %v943_v19, %v246_v30 }
  0xe7   :  { %219 = vst [vmem:[#allocation2 + $0x88] sm:$0xf0] %v207_v33  ;;  %692 = vmatpush.msk.msra.mxu0 %vm509_vm7, %v493_v0  ;;  %600 = vmatpush.msra.mxu3 %v490_v37  ;;  %v498_v14 = vld [vmem:[#allocation2 + $0x20] sm:$0xf] }
  0xe8   :  { %220 = vst [vmem:[#allocation2 + $0xe8] sm:$0xf0] %v208_v34  ;;  %702 = vmatpush.msk.msrb.mxu1 %vm509_vm7, %v498_v14 }
  0xe9   :  { %221 = vst [vmem:[#allocation2 + $0xb8] sm:$0xf0] %v209_v35  ;;  %540 = vmatpush.msra.mxu0 %v487_v39 }
  0xea   :  { %260 = vst [vmem:[#allocation2 + $0x70] sm:$0xf] %v254_v38 }
  0xeb   :  { %541 = vmatpush.msra.mxu0 %v481_v41  ;;  %v82_v19 = vpop.permute.xlu0 %81  ;;  %v148_v42 = vpop.permute.xlu2 %147 }
  0xec   :  { %v92_v43 = vsel %vm89_vm0, %v901_v62, %v82_v19  ;;  %v155_v44 = vsel %vm149_vm1, %v148_v42, %v895_v57  ;;  %v84_v48 = vpop.permute.xlu1 %83  ;;  %v477_v57 = vld [vmem:[#allocation2 + $0x80] sm:$0xff] }
  0xed   :  { %v104_v49 = vrot.slane %v92_v43, 4  ;;  %161 = vst [vmem:[#allocation2 + $0xb8] sm:$0xf] %v155_v44  ;;  %542 = vmatpush.msra.mxu0 %v475_v46  ;;  %v91_v50 = vsel %vm89_vm0, %v82_v19, %v84_v48  ;;  %v484_v51 = vld [vmem:[#allocation2 + $0x40] sm:$0xff] }
  0xee   :  { %v105_v53 = vrot.slane %v91_v50, 4  ;;  %601 = vmatpush.msra.mxu3 %v484_v51 }
  0xef   :  { %116 = vst [vmem:[#allocation2 + $0xd8] sm:$0xf0] %v104_v49  ;;  %543 = vmatpush.msra.mxu0 %v469_v54 }
  0xf0   :  { %117 = vst [vmem:[#allocation2 + $0x18] sm:$0xf0] %v105_v53  ;;  %693 = vmatmul.msk.f32.vlgmr.msra.gmra.mxu0 %vm505_vm9, %v1045_v40 }
  0xf1   :  { %700 = vmatpush.msk.msrb.mxu0 %vm509_vm7, %v497_v55  ;;  %v483_v62 = vld [vmem:[#allocation2 + $0x70] sm:$0xff] }
  0xf2   :  { %581 = vmatpush.msra.mxu2 %v483_v62 }
  0xf3   :  { %v146_v58 = vpop.permute.xlu0 %145 }
  0xf4   :  { %582 = vmatpush.msra.mxu2 %v477_v57  ;;  %v150_v63 = vsel %vm149_vm1, %v146_v58, %v148_v42  ;;  %v151_v3 = vsel %vm149_vm1, %v1003_v1, %v146_v58  ;;  %v394_v4 = vpop.permute.xlu1 %393  ;;  %v480_v29 = vld [vmem:[#allocation2 + $0xb8] sm:$0xff] }
  0xf5   :  { %159 = vst [vmem:[#allocation2 + $0x88] sm:$0xf] %v151_v3  ;;  %v396_v6 = vsel %vm395_vm8, %v1005_v2, %v394_v4  ;;  %v401_v7 = vsel %vm395_vm8, %v394_v4, %v984_v45 }
  0xf6   :  { %160 = vst [vmem:[#allocation2 + $0xe8] sm:$0xf] %v150_v63  ;;  %v412_v8 = vrot.slane %v396_v6, 4  ;;  %v413_v9 = vrot.slane %v401_v7, 4  ;;  %v471_v10 = vld [vmem:[#allocation2 + $0xd8] sm:$0xff] }
  0xf7   :  { %583 = vmatpush.msra.mxu2 %v471_v10  ;;  %v472_v17 = vld [vmem:[#allocation2 + $0x18] sm:$0xff] }
  0xf8   :  { %424 = vst [vmem:[#allocation2 + $0x90] sm:$0xf0] %v412_v8  ;;  %697 = vmatmul.msk.f32.vlgmr.msra.gmra.mxu2 %vm505_vm9, %v1045_v40 }
  0xf9   :  { %425 = vst [vmem:[#allocation2 + $0xa0] sm:$0xf0] %v413_v9 }
  0xfb   :  { %v292_v1 = vpop.permute.xlu0 %291 }
  0xfc   :  { %v294_v11 = vsel %vm293_vm4, %v945_v20, %v292_v1  ;;  %v299_v2 = vsel %vm293_vm4, %v292_v1, %v956_v25  ;;  %v352_v45 = vpop.permute.xlu1 %351  ;;  %v478_v12 = vld [vmem:[#allocation2 + $0x88] sm:$0xff] }
  0xfd   :  { %v310_v13 = vrot.slane %v294_v11, 4  ;;  %v311_v15 = vrot.slane %v299_v2, 4  ;;  %v354_v5 = vsel %vm353_vm5, %v986_v47, %v352_v45  ;;  %602 = vmatpush.msra.mxu3 %v478_v12  ;;  %v359_v16 = vsel %vm353_vm5, %v352_v45, %v963_v31  ;;  %v479_v28 = vld [vmem:[#allocation2 + $0xe8] sm:$0xff] }
  0xfe   :  { %364 = vst [vmem:[#allocation2 + $0x90] sm:$0xf] %v354_v5 }
  0xff   :  { %322 = vst [vmem:[#allocation2 + $0x8] sm:$0xf0] %v310_v13  ;;  %603 = vmatpush.msra.mxu3 %v472_v17 }
 0x100   :  { %323 = vst [vmem:[#allocation2 + $0x78] sm:$0xf0] %v311_v15  ;;  %699 = vmatmul.msk.f32.vlgmr.msra.gmra.mxu3 %vm505_vm9, %v1045_v40 }
 0x101   :  { %365 = vst [vmem:[#allocation2 + $0xa0] sm:$0xf] %v359_v16 }
 0x103   :  { %v250_v20 = vpop.permute.xlu0 %249 }
 0x104   :  { %v252_v25 = vsel %vm251_vm3, %v995_v52, %v250_v20  ;;  %v257_v47 = vsel %vm251_vm3, %v250_v20, %v950_v22  ;;  %v86_v18 = vpop.permute.xlu1 %85 }
 0x105   :  { %262 = vst [vmem:[#allocation2 + $0x8] sm:$0xf] %v252_v25  ;;  %v90_v31 = vsel %vm89_vm0, %v84_v48, %v86_v18  ;;  %v95_v21 = vsel %vm89_vm0, %v86_v18, %v887_v56  ;;  %v491_v23 = vld [vmem:[#allocation2 + $0x90] sm:$0xff] }
 0x106   :  { %263 = vst [vmem:[#allocation2 + $0x78] sm:$0xf] %v257_v47  ;;  %v106_v24 = vrot.slane %v90_v31, 4  ;;  %v107_v26 = vrot.slane %v95_v21, 4  ;;  %620 = vmatpush.msrb.mxu0 %v491_v23 }
 0x108   :  { %118 = vst [vmem:[#allocation2 + $0x50] sm:$0xf0] %v106_v24  ;;  %v492_v52 = vld [vmem:[#allocation2 + $0xa0] sm:$0xff] }
 0x109   :  { %119 = vst [vmem:[#allocation2 + $0x68] sm:$0xf0] %v107_v26  ;;  %640 = vmatpush.msrb.mxu1 %v492_v52 }
 0x10c   :  { %v485_v27 = vld [vmem:[#allocation2 + $0x8] sm:$0xff] }
 0x10d   :  { %621 = vmatpush.msrb.mxu0 %v485_v27  ;;  %v486_v22 = vld [vmem:[#allocation2 + $0x78] sm:$0xff] }
 0x10e   :  { %641 = vmatpush.msrb.mxu1 %v486_v22 }
 0x10f   :  { %622 = vmatpush.msrb.mxu0 %v479_v28  ;;  %v473_v30 = vld [vmem:[#allocation2 + $0x50] sm:$0xff] }
 0x110   :  { %642 = vmatpush.msrb.mxu1 %v480_v29  ;;  %v474_v56 = vld [vmem:[#allocation2 + $0x68] sm:$0xff] }
 0x111   :  { %623 = vmatpush.msrb.mxu0 %v473_v30 }
 0x112   :  { %643 = vmatpush.msrb.mxu1 %v474_v56  ;;  %701 = vmatmul.msk.f32.vlgmr.msrb.gmra.mxu0 %vm505_vm9, %v1045_v40 }
 0x113   :  { %703 = vmatmul.msk.f32.vlgmr.msrb.gmra.mxu1 %vm505_vm9, %v1045_v40 }
 0x143   :  { %v503_v61 = vpop.permute.xlu0 %502 }
 0x15c   :  { %v565_v32 = vpop.f32.mrf.mxu1 }
 0x15d   :  { %v566_v33 = vadd.f32 %v565_v32, %v503_v61 }
 0x15f   :  { %vm649_vm10 = vcmp.gt.f32.partialorder %v566_v33, 0.0  ;;  %v655_v34 = vmul.f32 0.1, %v566_v33 }
 0x161   :  { %v661_v35 = vsel %vm649_vm10, %v566_v33, %v655_v34 }
 0x162   :  { %667 = vst [vmem:[#allocation6 + $0x8] sm:$0xff] %v661_v35 }
 0x16d   :  { %v545_v36 = vpop.f32.mrf.mxu0 }
 0x16e   :  { %v546_v0 = vadd.f32 %v545_v36, %v503_v61 }
 0x170   :  { %vm648_vm11 = vcmp.gt.f32.partialorder %v546_v0, 0.0  ;;  %v654_v37 = vmul.f32 0.1, %v546_v0 }
 0x172   :  { %v660_v38 = vsel %vm648_vm11, %v546_v0, %v654_v37 }
 0x173   :  { %666 = vst [vmem:[#allocation6] sm:$0xff] %v660_v38 }
 0x17b   :  { %v585_v14 = vpop.f32.mrf.mxu2 }
 0x17c   :  { %v586_v39 = vadd.f32 %v585_v14, %v503_v61 }
 0x17e   :  { %vm650_vm12 = vcmp.gt.f32.partialorder %v586_v39, 0.0  ;;  %v656_v41 = vmul.f32 0.1, %v586_v39 }
 0x180   :  { %v662_v19 = vsel %vm650_vm12, %v586_v39, %v656_v41 }
 0x181   :  { %668 = vst [vmem:[#allocation6 + $0x10] sm:$0xff] %v662_v19 }
 0x183   :  { %v605_v40 = vpop.f32.mrf.mxu3 }
 0x184   :  { %v606_v42 = vadd.f32 %v605_v40, %v503_v61 }
 0x186   :  { %vm651_vm13 = vcmp.gt.f32.partialorder %v606_v42, 0.0  ;;  %v657_v43 = vmul.f32 0.1, %v606_v42 }
 0x188   :  { %v663_v44 = vsel %vm651_vm13, %v606_v42, %v657_v43 }
 0x189   :  { %670 = vst [vmem:[#allocation6 + $0x18] sm:$0xff] %v663_v44 }
 0x18f   :  { %v625_v46 = vpop.f32.mrf.mxu0 }
 0x190   :  { %v626_v48 = vadd.f32 %v625_v46, %v503_v61  ;;  %v645_v49 = vpop.f32.mrf.mxu1 }
 0x191   :  { %v646_v50 = vadd.f32 %v645_v49, %v503_v61 }
 0x192   :  { %vm652_vm14 = vcmp.gt.f32.partialorder %v626_v48, 0.0  ;;  %v658_v51 = vmul.f32 0.1, %v626_v48 }
 0x193   :  { %vm653_vm15 = vcmp.gt.f32.partialorder %v646_v50, 0.0  ;;  %v659_v53 = vmul.f32 0.1, %v646_v50 }
 0x194   :  { %v664_v54 = vsel %vm652_vm14, %v626_v48, %v658_v51 }
 0x195   :  { %671 = vst [vmem:[#allocation6 + $0x20] sm:$0xff] %v664_v54  ;;  %v665_v55 = vsel %vm653_vm15, %v646_v50, %v659_v53 }
 0x196   :  { %672 = vst [vmem:[#allocation6 + $0x28] sm:$0xff] %v665_v55 }
 0x197   :  { %685 = dma.vmem_to_hbm [thread:$0]  %s678_s27, 768, %s680_s30, [#allocation5], %s781_s4, %s781_s4, %s782_s5  }
 0x198   :  { %768 = dma.done.wait [#allocation5], 768  }
 0x199   :  { %769 = vsyncadd [#allocation5], 4294966528 }
 0x19a   :  { %690 = vsyncpa [#allocation4], 1 }
 0x19b   :  { %691 = vsyncpa [#allocation5], 1 }

</bundles_post_ra>
